<compile_context>
chip_gen: v6e
topology: v6e:2x2x1
jax: 0.10.0
libtpu: 0.0.40
codegen_flags: <defaults>
</compile_context>

<pallas_src>
import functools
import math

import jax
import jax.numpy as jnp
from jax.experimental import pallas as pl
from jax.experimental.pallas import tpu as pltpu


# ----------------------------------------------------------------------------
# Kernels
# ----------------------------------------------------------------------------

def _softmax_slices_to_out(y, o_ref, n_exp, C):
    """Per-expert softmax over the fused [*, n_exp*C] logits, stored slice-wise."""
    for e in range(n_exp):
        ye = y[:, e * C:(e + 1) * C]
        m = jnp.max(ye, axis=-1, keepdims=True)
        ez = jnp.exp(ye - m)
        denom = jnp.sum(ez, axis=-1, keepdims=True)
        inv = pl.reciprocal(denom, approx=True)       # EUP slot (otherwise idle)
        inv = inv * (2.0 - denom * inv)               # 1 Newton step -> ~f32 exact
        o_ref[:, e * C:(e + 1) * C] = (ez * inv).astype(o_ref.dtype)


def _fused_small_kernel(x_ref, w_ref, b_ref, o_ref, *, n_exp, C):
    # x_ref: (B, F)  w_ref: (F, n_exp*C)  b_ref: (1, n_exp*C)  o_ref: (B, n_exp*C)
    y = jnp.dot(x_ref[...], w_ref[...], preferred_element_type=jnp.float32)
    y = y + b_ref[...]
    _softmax_slices_to_out(y, o_ref, n_exp, C)


def _fused_tiled_kernel(x_ref, w_ref, b_ref, o_ref, acc_ref, *, n_exp, C):
    # Grid: (B//tm, F//tk); K reduction is the LAST axis ("arbitrary").
    k = pl.program_id(1)

    @pl.when(k == 0)
    def _():
        acc_ref[...] = jnp.zeros_like(acc_ref)

    acc_ref[...] += jnp.dot(x_ref[...], w_ref[...],
                            preferred_element_type=jnp.float32)

    @pl.when(k == pl.num_programs(1) - 1)
    def _():
        y = acc_ref[...] + b_ref[...]
        _softmax_slices_to_out(y, o_ref, n_exp, C)


def _single_expert_kernel(idx_ref, x_ref, w_ref, b_ref, o_ref):
    # Expert block already selected by the scalar-prefetch index_map.
    # x_ref: (B, F)  w_ref: (1, F, C)  b_ref: (1, 1, C)  o_ref: (B, C)
    del idx_ref  # only used inside the index_maps
    y = jnp.dot(x_ref[...], w_ref[0], preferred_element_type=jnp.float32)
    o_ref[...] = (y + b_ref[0]).astype(o_ref.dtype)


# ----------------------------------------------------------------------------
# Wrappers
# ----------------------------------------------------------------------------

def _ensemble_all(x, w_fused, b_fused, n_exp, C):
    """softmax(Linear_e(x)) for all experts. Returns fused [B, n_exp*C]."""
    B, F = x.shape
    NC = n_exp * C

    # Tiled production path: B tiles "parallel" (megacore / v7x 2 TCs),
    # K tiles "arbitrary" with a VMEM accumulator; full fused-C per block.
    tiled = (B % 128 == 0) and (F % 128 == 0) and (NC % 128 == 0)
    if tiled:
        tm = 128
        tk = 256 if F % 256 == 0 else 128     # 256 for v6e/v7x MXU, 128-safe for v5e
        itemsize = jnp.dtype(x.dtype).itemsize
        need = (2 * (tm * tk + tk * NC) * itemsize      # double-buffered x / w blocks
                + 2 * tm * NC * 4                        # double-buffered output block
                + tm * NC * 4                            # f32 accumulator
                + 2 * NC * 4)                            # bias row
        vmem_limit = min(64 << 20, max(32 << 20, 2 * need))   # v7x-safe cap
        kernel = functools.partial(_fused_tiled_kernel, n_exp=n_exp, C=C)
        return pl.pallas_call(
            kernel,
            out_shape=jax.ShapeDtypeStruct((B, NC), jnp.float32),
            grid_spec=pltpu.PrefetchScalarGridSpec(
                num_scalar_prefetch=0,
                grid=(B // tm, F // tk),
                in_specs=[
                    pl.BlockSpec((tm, tk), lambda i, k: (i, k)),
                    pl.BlockSpec((tk, NC), lambda i, k: (k, 0)),
                    pl.BlockSpec((1, NC), lambda i, k: (0, 0)),
                ],
                out_specs=pl.BlockSpec((tm, NC), lambda i, k: (i, 0)),
                scratch_shapes=[pltpu.VMEM((tm, NC), jnp.float32)],
            ),
            compiler_params=pltpu.CompilerParams(
                dimension_semantics=("parallel", "arbitrary"),
                vmem_limit_bytes=int(vmem_limit)),
        )(x, w_fused, b_fused)

    # Small / irregular shapes: everything co-resident in VMEM, one grid step.
    kernel = functools.partial(_fused_small_kernel, n_exp=n_exp, C=C)
    return pl.pallas_call(
        kernel,
        out_shape=jax.ShapeDtypeStruct((B, NC), jnp.float32),
        grid_spec=pltpu.PrefetchScalarGridSpec(
            num_scalar_prefetch=0,
            grid=(1,),
            in_specs=[
                pl.BlockSpec((B, F), lambda i: (0, 0)),
                pl.BlockSpec((F, NC), lambda i: (0, 0)),
                pl.BlockSpec((1, NC), lambda i: (0, 0)),
            ],
            out_specs=pl.BlockSpec((B, NC), lambda i: (0, 0)),
        ),
        compiler_params=pltpu.CompilerParams(
            dimension_semantics=("arbitrary",)),
    )(x, w_fused, b_fused)


def _single_expert(x, w_stack, b_stack, expert):
    """Raw Linear output of one expert, selected via scalar prefetch."""
    n_exp, F, C = w_stack.shape
    B = x.shape[0]
    b3 = b_stack.reshape(n_exp, 1, C)
    idx = jnp.asarray([expert], dtype=jnp.int32)
    return pl.pallas_call(
        _single_expert_kernel,
        out_shape=jax.ShapeDtypeStruct((B, C), jnp.float32),
        grid_spec=pltpu.PrefetchScalarGridSpec(
            num_scalar_prefetch=1,
            grid=(1,),
            in_specs=[
                pl.BlockSpec((B, F), lambda i, idx_ref: (0, 0)),
                pl.BlockSpec((1, F, C), lambda i, idx_ref: (idx_ref[0], 0, 0)),
                pl.BlockSpec((1, 1, C), lambda i, idx_ref: (idx_ref[0], 0, 0)),
            ],
            out_specs=pl.BlockSpec((B, C), lambda i, idx_ref: (0, 0)),
        ),
        compiler_params=pltpu.CompilerParams(
            dimension_semantics=("arbitrary",)),
    )(idx, x, w_stack, b3)


def ensemble_forward(x, w_stack, b_stack, index: int = 0):
    """Mirrors Ensemble.forward.

    index in {1..5}: raw Linear output of fc{index} -> [B, C].
    otherwise:       5-tuple of softmax(Linear_i(x)), each [B, C].
    """
    n_exp, F, C = w_stack.shape
    if index in (1, 2, 3, 4, 5):
        return _single_expert(x, w_stack, b_stack, index - 1)
    # Fuse weights to a lane-dense [F, n_exp*C] slab (columns grouped per
    # expert) and biases to [1, n_exp*C]; one matmul serves all experts.
    w_fused = jnp.transpose(w_stack, (1, 0, 2)).reshape(F, n_exp * C)
    b_fused = b_stack.reshape(1, n_exp * C)
    y = _ensemble_all(x, w_fused, b_fused, n_exp, C)      # [B, n_exp*C]
    return tuple(y[:, e * C:(e + 1) * C] for e in range(n_exp))


# ----------------------------------------------------------------------------
# Parameter init (matches the PyTorch module's init choices / shapes)
# ----------------------------------------------------------------------------

def init_params(key, in_feature: int, num_classes: int):
    """fc1: PyTorch default, fc2: xavier_uniform(relu gain), fc3: xavier_normal,
    fc4: kaiming_uniform(relu), fc5: kaiming_normal. Weights stored as [F, C]."""
    keys = jax.random.split(key, 10)
    F, C = in_feature, num_classes
    fan_in, fan_out = F, C

    def uniform(k, bound):
        return jax.random.uniform(k, (F, C), jnp.float32, -bound, bound)

    def normal(k, std):
        return jax.random.normal(k, (F, C), jnp.float32) * std

    relu_gain = math.sqrt(2.0)
    w1 = uniform(keys[0], 1.0 / math.sqrt(fan_in))
    w2 = uniform(keys[1], relu_gain * math.sqrt(6.0 / (fan_in + fan_out)))
    w3 = normal(keys[2], math.sqrt(2.0 / (fan_in + fan_out)))
    w4 = uniform(keys[3], math.sqrt(6.0 / fan_in))
    w5 = normal(keys[4], math.sqrt(2.0 / fan_in) / math.sqrt(1.0 + 0.01 ** 2))

    bias_bound = 1.0 / math.sqrt(fan_in)
    biases = [
        jax.random.uniform(keys[5 + i], (C,), jnp.float32, -bias_bound, bias_bound)
        for i in range(5)
    ]
    w_stack = jnp.stack([w1, w2, w3, w4, w5], axis=0)    # [5, F, C]
    b_stack = jnp.stack(biases, axis=0)                   # [5, C]
    return w_stack, b_stack


def _reference(x, w_stack, b_stack, index: int = 0):
    dot = functools.partial(jnp.dot, precision=jax.lax.Precision.HIGHEST)
    if index in (1, 2, 3, 4, 5):
        e = index - 1
        return dot(x, w_stack[e]) + b_stack[e]
    return tuple(jax.nn.softmax(dot(x, w_stack[e]) + b_stack[e], axis=-1)
                 for e in range(w_stack.shape[0]))


# ----------------------------------------------------------------------------
# Main
# ----------------------------------------------------------------------------

if __name__ == "__main__":
    # ---- Small shapes (module-consistent): single-block fused path ----------
    in_feature, num_classes, batch = 32, 8, 2
    key = jax.random.PRNGKey(0)
    kx, kp, kx2, kp2 = jax.random.split(key, 4)
    x = jax.random.normal(kx, (batch, in_feature), jnp.float32)
    w_stack, b_stack = init_params(kp, in_feature, num_classes)

    outs = jax.block_until_ready(ensemble_forward(x, w_stack, b_stack, index=0))
    refs = _reference(x, w_stack, b_stack, index=0)
    for o, r in zip(outs, refs):
        assert o.shape == (batch, num_classes)
        assert jnp.allclose(o, r, atol=1e-5, rtol=1e-5)

    y3 = jax.block_until_ready(ensemble_forward(x, w_stack, b_stack, index=3))
    r3 = _reference(x, w_stack, b_stack, index=3)
    assert y3.shape == (batch, num_classes)
    assert jnp.allclose(y3, r3, atol=1e-5, rtol=1e-5)

    # ---- Production-like shapes: tiled path (K accumulator + parallel B) ----
    B2, F2, C2 = 256, 512, 128
    x2 = jax.random.normal(kx2, (B2, F2), jnp.float32)
    w_stack2, b_stack2 = init_params(kp2, F2, C2)

    outs2 = jax.block_until_ready(ensemble_forward(x2, w_stack2, b_stack2, index=0))
    refs2 = _reference(x2, w_stack2, b_stack2, index=0)
    for o, r in zip(outs2, refs2):
        assert o.shape == (B2, C2)
        assert jnp.allclose(o, r, atol=1e-4, rtol=1e-4)

    y2 = jax.block_until_ready(ensemble_forward(x2, w_stack2, b_stack2, index=2))
    r2 = _reference(x2, w_stack2, b_stack2, index=2)
    assert y2.shape == (B2, C2)
    assert jnp.allclose(y2, r2, atol=1e-4, rtol=1e-4)

    print("KERNEL_OK")
</pallas_src>

<mosaic_0001>
module attributes {stable_mosaic.version = 11 : i64} {
  func.func @_fused_small_kernel(%arg0: i32, %arg1: memref<2x32xf32, #tpu.memory_space<vmem>>, %arg2: memref<32x40xf32, #tpu.memory_space<vmem>>, %arg3: memref<1x40xf32, #tpu.memory_space<vmem>>, %arg4: memref<2x40xf32, #tpu.memory_space<vmem>>) attributes {dimension_semantics = [#tpu.dimension_semantics<arbitrary>], iteration_bounds = array<i64: 1>, scalar_prefetch = 0 : i64, scratch_operands = 0 : i64, tpu.core_type = #tpu.core_type<tc>, window_params = [{pipeline_mode = #tpu.pipeline_mode<synchronous>, transform_indices = @transform_0, window_bounds = array<i64: 2, 32>}, {pipeline_mode = #tpu.pipeline_mode<synchronous>, transform_indices = @transform_1, window_bounds = array<i64: 32, 40>}, {pipeline_mode = #tpu.pipeline_mode<synchronous>, transform_indices = @transform_2, window_bounds = array<i64: 1, 40>}, {pipeline_mode = #tpu.pipeline_mode<synchronous>, transform_indices = @transform_3, window_bounds = array<i64: 2, 40>}]} {
    %c0 = arith.constant 0 : index
    %c0_0 = arith.constant 0 : index
    %0 = vector.load %arg1[%c0, %c0_0] : memref<2x32xf32, #tpu.memory_space<vmem>>, vector<2x32xf32>
    %c0_1 = arith.constant 0 : index
    %c0_2 = arith.constant 0 : index
    %1 = vector.load %arg2[%c0_1, %c0_2] : memref<32x40xf32, #tpu.memory_space<vmem>>, vector<32x40xf32>
    %cst = arith.constant dense<0.000000e+00> : vector<2x40xf32>
    %2 = tpu.matmul %0, %1, %cst {dimension_numbers = #tpu.dot_dimension_numbers<[1], [0], [0], [1], [0, 0, 1, 1], [], []>} : vector<2x32xf32>, vector<32x40xf32>, vector<2x40xf32> -> vector<2x40xf32>
    %c0_3 = arith.constant 0 : index
    %c0_4 = arith.constant 0 : index
    %3 = vector.load %arg3[%c0_3, %c0_4] : memref<1x40xf32, #tpu.memory_space<vmem>>, vector<1x40xf32>
    %4 = vector.broadcast %3 : vector<1x40xf32> to vector<2x40xf32>
    %5 = arith.addf %2, %4 : vector<2x40xf32>
    %6 = vector.extract_strided_slice %5 {offsets = [0, 0], sizes = [2, 8], strides = [1, 1]} : vector<2x40xf32> to vector<2x8xf32>
    %cst_5 = arith.constant dense<0xFF800000> : vector<2xf32>
    %7 = vector.multi_reduction <maximumf>, %6, %cst_5 [1] : vector<2x8xf32> to vector<2xf32>
    %8 = vector.shape_cast %7 : vector<2xf32> to vector<2x1xf32>
    %9 = vector.broadcast %8 : vector<2x1xf32> to vector<2x8xf32>
    %10 = arith.subf %6, %9 : vector<2x8xf32>
    %11 = math.exp %10 : vector<2x8xf32>
    %cst_6 = arith.constant dense<0.000000e+00> : vector<2xf32>
    %12 = vector.multi_reduction <add>, %11, %cst_6 [1] : vector<2x8xf32> to vector<2xf32>
    %13 = vector.shape_cast %12 : vector<2xf32> to vector<2x1xf32>
    %14 = tpu.reciprocal %13 {approx = true} : vector<2x1xf32> -> vector<2x1xf32>
    %15 = arith.mulf %13, %14 : vector<2x1xf32>
    %cst_7 = arith.constant 2.000000e+00 : f32
    %16 = vector.broadcast %cst_7 : f32 to vector<2x1xf32>
    %17 = arith.subf %16, %15 : vector<2x1xf32>
    %18 = arith.mulf %14, %17 : vector<2x1xf32>
    %19 = vector.broadcast %18 : vector<2x1xf32> to vector<2x8xf32>
    %20 = arith.mulf %11, %19 : vector<2x8xf32>
    %c0_8 = arith.constant 0 : index
    %c0_9 = arith.constant 0 : index
    %21 = vector.load %arg4[%c0_8, %c0_9] : memref<2x40xf32, #tpu.memory_space<vmem>>, vector<2x8xf32>
    tpu.vector_store %arg4[%c0_8, %c0_9], %20 {strides = array<i32>} : memref<2x40xf32, #tpu.memory_space<vmem>>, vector<2x8xf32>,
    %22 = vector.extract_strided_slice %5 {offsets = [0, 8], sizes = [2, 8], strides = [1, 1]} : vector<2x40xf32> to vector<2x8xf32>
    %cst_10 = arith.constant dense<0xFF800000> : vector<2xf32>
    %23 = vector.multi_reduction <maximumf>, %22, %cst_10 [1] : vector<2x8xf32> to vector<2xf32>
    %24 = vector.shape_cast %23 : vector<2xf32> to vector<2x1xf32>
    %25 = vector.broadcast %24 : vector<2x1xf32> to vector<2x8xf32>
    %26 = arith.subf %22, %25 : vector<2x8xf32>
    %27 = math.exp %26 : vector<2x8xf32>
    %cst_11 = arith.constant dense<0.000000e+00> : vector<2xf32>
    %28 = vector.multi_reduction <add>, %27, %cst_11 [1] : vector<2x8xf32> to vector<2xf32>
    %29 = vector.shape_cast %28 : vector<2xf32> to vector<2x1xf32>
    %30 = tpu.reciprocal %29 {approx = true} : vector<2x1xf32> -> vector<2x1xf32>
    %31 = arith.mulf %29, %30 : vector<2x1xf32>
    %cst_12 = arith.constant 2.000000e+00 : f32
    %32 = vector.broadcast %cst_12 : f32 to vector<2x1xf32>
    %33 = arith.subf %32, %31 : vector<2x1xf32>
    %34 = arith.mulf %30, %33 : vector<2x1xf32>
    %35 = vector.broadcast %34 : vector<2x1xf32> to vector<2x8xf32>
    %36 = arith.mulf %27, %35 : vector<2x8xf32>
    %c0_13 = arith.constant 0 : index
    %c8 = arith.constant 8 : index
    %37 = vector.load %arg4[%c0_13, %c8] : memref<2x40xf32, #tpu.memory_space<vmem>>, vector<2x8xf32>
    tpu.vector_store %arg4[%c0_13, %c8], %36 {strides = array<i32>} : memref<2x40xf32, #tpu.memory_space<vmem>>, vector<2x8xf32>,
    %38 = vector.extract_strided_slice %5 {offsets = [0, 16], sizes = [2, 8], strides = [1, 1]} : vector<2x40xf32> to vector<2x8xf32>
    %cst_14 = arith.constant dense<0xFF800000> : vector<2xf32>
    %39 = vector.multi_reduction <maximumf>, %38, %cst_14 [1] : vector<2x8xf32> to vector<2xf32>
    %40 = vector.shape_cast %39 : vector<2xf32> to vector<2x1xf32>
    %41 = vector.broadcast %40 : vector<2x1xf32> to vector<2x8xf32>
    %42 = arith.subf %38, %41 : vector<2x8xf32>
    %43 = math.exp %42 : vector<2x8xf32>
    %cst_15 = arith.constant dense<0.000000e+00> : vector<2xf32>
    %44 = vector.multi_reduction <add>, %43, %cst_15 [1] : vector<2x8xf32> to vector<2xf32>
    %45 = vector.shape_cast %44 : vector<2xf32> to vector<2x1xf32>
    %46 = tpu.reciprocal %45 {approx = true} : vector<2x1xf32> -> vector<2x1xf32>
    %47 = arith.mulf %45, %46 : vector<2x1xf32>
    %cst_16 = arith.constant 2.000000e+00 : f32
    %48 = vector.broadcast %cst_16 : f32 to vector<2x1xf32>
    %49 = arith.subf %48, %47 : vector<2x1xf32>
    %50 = arith.mulf %46, %49 : vector<2x1xf32>
    %51 = vector.broadcast %50 : vector<2x1xf32> to vector<2x8xf32>
    %52 = arith.mulf %43, %51 : vector<2x8xf32>
    %c0_17 = arith.constant 0 : index
    %c16 = arith.constant 16 : index
    %53 = vector.load %arg4[%c0_17, %c16] : memref<2x40xf32, #tpu.memory_space<vmem>>, vector<2x8xf32>
    tpu.vector_store %arg4[%c0_17, %c16], %52 {strides = array<i32>} : memref<2x40xf32, #tpu.memory_space<vmem>>, vector<2x8xf32>,
    %54 = vector.extract_strided_slice %5 {offsets = [0, 24], sizes = [2, 8], strides = [1, 1]} : vector<2x40xf32> to vector<2x8xf32>
    %cst_18 = arith.constant dense<0xFF800000> : vector<2xf32>
    %55 = vector.multi_reduction <maximumf>, %54, %cst_18 [1] : vector<2x8xf32> to vector<2xf32>
    %56 = vector.shape_cast %55 : vector<2xf32> to vector<2x1xf32>
    %57 = vector.broadcast %56 : vector<2x1xf32> to vector<2x8xf32>
    %58 = arith.subf %54, %57 : vector<2x8xf32>
    %59 = math.exp %58 : vector<2x8xf32>
    %cst_19 = arith.constant dense<0.000000e+00> : vector<2xf32>
    %60 = vector.multi_reduction <add>, %59, %cst_19 [1] : vector<2x8xf32> to vector<2xf32>
    %61 = vector.shape_cast %60 : vector<2xf32> to vector<2x1xf32>
    %62 = tpu.reciprocal %61 {approx = true} : vector<2x1xf32> -> vector<2x1xf32>
    %63 = arith.mulf %61, %62 : vector<2x1xf32>
    %cst_20 = arith.constant 2.000000e+00 : f32
    %64 = vector.broadcast %cst_20 : f32 to vector<2x1xf32>
    %65 = arith.subf %64, %63 : vector<2x1xf32>
    %66 = arith.mulf %62, %65 : vector<2x1xf32>
    %67 = vector.broadcast %66 : vector<2x1xf32> to vector<2x8xf32>
    %68 = arith.mulf %59, %67 : vector<2x8xf32>
    %c0_21 = arith.constant 0 : index
    %c24 = arith.constant 24 : index
    %69 = vector.load %arg4[%c0_21, %c24] : memref<2x40xf32, #tpu.memory_space<vmem>>, vector<2x8xf32>
    tpu.vector_store %arg4[%c0_21, %c24], %68 {strides = array<i32>} : memref<2x40xf32, #tpu.memory_space<vmem>>, vector<2x8xf32>,
    %70 = vector.extract_strided_slice %5 {offsets = [0, 32], sizes = [2, 8], strides = [1, 1]} : vector<2x40xf32> to vector<2x8xf32>
    %cst_22 = arith.constant dense<0xFF800000> : vector<2xf32>
    %71 = vector.multi_reduction <maximumf>, %70, %cst_22 [1] : vector<2x8xf32> to vector<2xf32>
    %72 = vector.shape_cast %71 : vector<2xf32> to vector<2x1xf32>
    %73 = vector.broadcast %72 : vector<2x1xf32> to vector<2x8xf32>
    %74 = arith.subf %70, %73 : vector<2x8xf32>
    %75 = math.exp %74 : vector<2x8xf32>
    %cst_23 = arith.constant dense<0.000000e+00> : vector<2xf32>
    %76 = vector.multi_reduction <add>, %75, %cst_23 [1] : vector<2x8xf32> to vector<2xf32>
    %77 = vector.shape_cast %76 : vector<2xf32> to vector<2x1xf32>
    %78 = tpu.reciprocal %77 {approx = true} : vector<2x1xf32> -> vector<2x1xf32>
    %79 = arith.mulf %77, %78 : vector<2x1xf32>
    %cst_24 = arith.constant 2.000000e+00 : f32
    %80 = vector.broadcast %cst_24 : f32 to vector<2x1xf32>
    %81 = arith.subf %80, %79 : vector<2x1xf32>
    %82 = arith.mulf %78, %81 : vector<2x1xf32>
    %83 = vector.broadcast %82 : vector<2x1xf32> to vector<2x8xf32>
    %84 = arith.mulf %75, %83 : vector<2x8xf32>
    %c0_25 = arith.constant 0 : index
    %c32 = arith.constant 32 : index
    %85 = vector.load %arg4[%c0_25, %c32] : memref<2x40xf32, #tpu.memory_space<vmem>>, vector<2x8xf32>
    tpu.vector_store %arg4[%c0_25, %c32], %84 {strides = array<i32>} : memref<2x40xf32, #tpu.memory_space<vmem>>, vector<2x8xf32>,
    return
  }
  func.func @transform_0(%arg0: i32) -> (i32, i32) {
    %c0_i32 = arith.constant 0 : i32
    %c0_i32_0 = arith.constant 0 : i32
    %c0_i32_1 = arith.constant 0 : i32
    return %c0_i32, %c0_i32_0 : i32, i32
  }
  func.func @transform_1(%arg0: i32) -> (i32, i32) {
    %c0_i32 = arith.constant 0 : i32
    %c0_i32_0 = arith.constant 0 : i32
    %c0_i32_1 = arith.constant 0 : i32
    return %c0_i32, %c0_i32_0 : i32, i32
  }
  func.func @transform_2(%arg0: i32) -> (i32, i32) {
    %c0_i32 = arith.constant 0 : i32
    %c0_i32_0 = arith.constant 0 : i32
    %c0_i32_1 = arith.constant 0 : i32
    return %c0_i32, %c0_i32_0 : i32, i32
  }
  func.func @transform_3(%arg0: i32) -> (i32, i32) {
    %c0_i32 = arith.constant 0 : i32
    %c0_i32_0 = arith.constant 0 : i32
    %c0_i32_1 = arith.constant 0 : i32
    return %c0_i32, %c0_i32_0 : i32, i32
  }
}

</mosaic_0001>

<bundles_post_ra>
// kernel: tpu_custom_call.1
= control target key start
LH: loop header
LB: loop body
LE: loop exit
PB: predicated region body
PF: predicated region fallthrough
CT: control target
= control target key end

     0   :  { %8 = vsyncpa [#allocation3], 0  ;;  %s416_s0 = inlined_call_operand.hbm [shape: f32[2,32], index: 0, kind: input, shape index: {}]   ;;  %s417_s1 = inlined_call_operand.hbm [shape: f32[32,40], index: 1, kind: input, shape index: {}]   ;;  %s418_s2 = inlined_call_operand.vmem [shape: f32[1,40], index: 2, kind: input, shape index: {}]   ;;  %s419_s3 = inlined_call_operand.hbm [shape: f32[2,40], index: 3, kind: output, shape index: {}]  }
   0x1   :  { %9 = vsyncpa [#allocation6], 0 }
   0x2   :  { %10 = vsyncpa [#allocation4], 0  ;;  %s354_s12 = smov [#allocation2]   ;;  %s355_s14 = smov [#allocation5]  }
   0x3   :  { %s17_s13 = sshll.u32 %s354_s12, 4  ;;  %s26_s15 = sshll.u32 %s355_s14, 4  ;;  %s18_s13 = int_to_ptr.vmem [resolvable:$true] %s17_s13  ;;  %s27_s15 = int_to_ptr.vmem [resolvable:$true] %s26_s15 }
   0x4   :  { %s296_s16 = scalar_lea.vmem %s18_s13, 32  ;;  %p301_p1 = scmp.lt.s32.totalorder %s18_s13, %s18_s13 }
   0x5   :  { %p297_p0 = scmp.ne.s32.totalorder %s18_s13, %s296_s16  ;;  %p302_p2 = scmp.lt.s32.totalorder %s296_s16, %s296_s16 }
   0x7   :  { %p303_p3 = por %p302_p2, %p301_p1 }
   0x9   :  { %p304_p4 = pnand %p303_p3, %p297_p0 }
   0xb   :  { %307 = shalt.err (!%p304_p4)
}
   0xc   :  { %20 = dma.hbm_to_vmem [thread:$0]  %s416_s0, 32, %s18_s13, [#allocation3]  }
   0xd   :  { %s316_s19 = scalar_lea.vmem %s27_s15, 512  ;;  %p321_p6 = scmp.lt.s32.totalorder %s27_s15, %s27_s15 }
   0xe   :  { %p317_p5 = scmp.ne.s32.totalorder %s27_s15, %s316_s19  ;;  %p322_p7 = scmp.lt.s32.totalorder %s316_s19, %s316_s19 }
  0x10   :  { %p323_p8 = por %p322_p7, %p321_p6 }
  0x12   :  { %p324_p9 = pnand %p323_p8, %p317_p5 }
  0x14   :  { %327 = shalt.err (!%p324_p9)
}
  0x15   :  { %s356_s20 = smov 128   ;;  %s357_s21 = smov 8  }
  0x16   :  { %32 = dma.hbm_to_vmem [thread:$0]  %s417_s1, 512, %s27_s15, [#allocation6], %s356_s20, %s356_s20, %s357_s21  }
  0x17   :  { %348 = dma.done.wait [#allocation3], 32  }
  0x18   :  { %349 = vsyncadd [#allocation3], 4294967264 }
  0x19   :  { %350 = dma.done.wait [#allocation6], 512  }
  0x1a   :  { %351 = vsyncadd [#allocation6], 4294966784  ;;  %v358_v0 = vmov 0.0   ;;  %vm359_vm0 = vmmov 0   ;;  %v45_v1 = vld [vmem:[#allocation5 + $0x18] sm:$0xff]  ;;  %v44_v2 = vld [vmem:[#allocation5 + $0x10] sm:$0xff] }
  0x1b   :  { %246 = vmatprep.subr.mxu0 %v358_v0  ;;  %254 = vmatprep.mubr.msk.f32.mxu0 %vm359_vm0, %v358_v0  ;;  %v43_v3 = vld [vmem:[#allocation5 + $0x8] sm:$0xff]  ;;  %v42_v4 = vld [vmem:[#allocation5] sm:$0xff]  ;;  %v41_v5 = vld [vmem:[#allocation2] sm:$0x3]  ;;  %vm53_vm1 = vcmask 261120   ;;  %vm183_vm2 = vcmask 255168  }
  0x1c   :  { %247 = vmatpush3.msra.mxu0 %v45_v1  ;;  %v239_v6 = vld [vmem:[%s418_s2] ss:$0 sm:$0xff]  ;;  %vm143_vm3 = vcmask 123968   ;;  %vm203_vm4 = vcmask 320768   ;;  %vm163_vm5 = vcmask 189568   ;;  %vm127_vm6 = vcmask 58368  }
  0x1d   :  { %248 = vmatprep.subr.mxu0 %v358_v0  ;;  %s360_s2 = smov 120   ;;  %s361_s24 = smov 104  }
  0x1e   :  { %249 = vmatpush3.msra.mxu0 %v44_v2  ;;  %s362_s25 = smov 112   ;;  %s363_s26 = smov 96  }
  0x1f   :  { %250 = vmatprep.subr.mxu0 %v358_v0  ;;  %s364_s27 = smov [#allocation7]  }
  0x20   :  { %251 = vmatpush3.msra.mxu0 %v43_v3  ;;  %s229_s28 = sshll.u32 %s364_s27, 4  ;;  %s230_s28 = int_to_ptr.vmem [resolvable:$true] %s229_s28 }
  0x21   :  { %252 = vmatprep.subr.mxu0 %v358_v0  ;;  %s328_s29 = scalar_lea.vmem %s230_s28, 32  ;;  %p333_p11 = scmp.lt.s32.totalorder %s230_s28, %s230_s28 }
  0x22   :  { %253 = vmatpush3.msra.mxu0 %v42_v4  ;;  %p329_p10 = scmp.ne.s32.totalorder %s230_s28, %s328_s29  ;;  %p334_p12 = scmp.lt.s32.totalorder %s328_s29, %s328_s29 }
  0x23   :  { %255 = vmatmul.mubr.msk.f32.vlgmr.msra.gmra.mxu0 %vm53_vm1, %v41_v5 }
  0x24   :  { %p335_p13 = por %p334_p12, %p333_p11 }
  0x26   :  { %p336_p0 = pnand %p335_p13, %p329_p10 }
  0xe3   :  { %v123_v7 = vpop.f32.mrf.mxu0 }
  0xe4   :  { %v124_v8 = vadd.f32 %v239_v6, %v123_v7 }
  0xe5   :  { %v256_v9 = vpop.f32.mrf.mxu0 }
  0xe6   :  { %v184_v10 = vsel %vm183_vm2, %v124_v8, -inf  ;;  %v144_v11 = vsel %vm143_vm3, %v124_v8, -inf  ;;  %v204_v12 = vsel %vm203_vm4, %v124_v8, -inf  ;;  %v164_v13 = vsel %vm163_vm5, %v124_v8, -inf }
  0xe7   :  { %185 = vmax.xlane.f32.xlu1 %v184_v10  ;;  %145 = vmax.xlane.f32.xlu0 %v144_v11  ;;  %v128_v14 = vsel %vm127_vm6, %v124_v8, -inf }
  0xeb   :  { %205 = vmax.xlane.f32.xlu1 %v204_v12  ;;  %165 = vmax.xlane.f32.xlu0 %v164_v13 }
  0xef   :  { %129 = vmax.xlane.f32.xlu0 %v128_v14 }
 0x170   :  { %v186_v15 = vpop.xlane.xlu1 %185  ;;  %v146_v16 = vpop.xlane.xlu0 %145 }
 0x171   :  { %v187_v17 = vsub.f32 %v124_v8, %v186_v15  ;;  %v147_v18 = vsub.f32 %v124_v8, %v146_v16 }
 0x173   :  { %v148_v19 = vmul.f32 1.442695, %v147_v18  ;;  %v188_v22 = vmul.f32 1.442695, %v187_v17 }
 0x174   :  { %v206_v20 = vpop.xlane.xlu1 %205  ;;  %v166_v21 = vpop.xlane.xlu0 %165 }
 0x175   :  { %v167_v23 = vsub.f32 %v124_v8, %v166_v21  ;;  %268 = vpow2.f32 %v148_v19  ;;  %v207_v24 = vsub.f32 %v124_v8, %v206_v20 }
 0x176   :  { %270 = vpow2.f32 %v188_v22 }
 0x177   :  { %v168_v25 = vmul.f32 1.442695, %v167_v23  ;;  %v208_v26 = vmul.f32 1.442695, %v207_v24 }
 0x178   :  { %v130_v31 = vpop.xlane.xlu0 %129 }
 0x179   :  { %272 = vpow2.f32 %v168_v25  ;;  %v131_v32 = vsub.f32 %v124_v8, %v130_v31 }
 0x17a   :  { %274 = vpow2.f32 %v208_v26 }
 0x17b   :  { %v132_v33 = vmul.f32 1.442695, %v131_v32 }
 0x17d   :  { %276 = vpow2.f32 %v132_v33 }
 0x182   :  { %v269_v27 = vpop.eup %268 }
 0x183   :  { %151 = vrot.lane.b32.xlu1 %v269_v27, %s360_s2  ;;  %v399_v28 = vpop.eup %270 }
 0x186   :  { %v273_v29 = vpop.eup %272 }
 0x187   :  { %191 = vrot.lane.b32.xlu1 %v399_v28, %s361_s24  ;;  %171 = vrot.lane.b32.xlu0 %v273_v29, %s362_s25  ;;  %v275_v30 = vpop.eup %274 }
 0x18a   :  { %v277_v34 = vpop.eup %276 }
 0x18b   :  { %211 = vrot.lane.b32.xlu1 %v275_v30, %s363_s26  ;;  %v134_v35 = vsel %vm127_vm6, %v277_v34, 0.0 }
 0x1af   :  { %135 = vadd.xlane.f32.xlu1 %v134_v35 }
 0x1f5   :  { %v152_v36 = vpop.permute.xlu1 %151 }
 0x1f6   :  { %v154_v37 = vsel %vm127_vm6, %v152_v36, 0.0 }
 0x1f7   :  { %155 = vadd.xlane.f32.xlu0 %v154_v37 }
 0x1f9   :  { %v192_v38 = vpop.permute.xlu1 %191  ;;  %v172_v39 = vpop.permute.xlu0 %171 }
 0x1fa   :  { %v174_v40 = vsel %vm127_vm6, %v172_v39, 0.0  ;;  %v194_v43 = vsel %vm127_vm6, %v192_v38, 0.0 }
 0x1fb   :  { %175 = vadd.xlane.f32.xlu0 %v174_v40 }
 0x1fd   :  { %v212_v41 = vpop.permute.xlu1 %211 }
 0x1fe   :  { %v214_v42 = vsel %vm127_vm6, %v212_v41, 0.0 }
 0x1ff   :  { %215 = vadd.xlane.f32.xlu1 %v214_v42  ;;  %195 = vadd.xlane.f32.xlu0 %v194_v43 }
 0x238   :  { %v136_v44 = vpop.xlane.xlu1 %135 }
 0x239   :  { %278 = vrcp.f32 %v136_v44 }
 0x246   :  { %v279_v45 = vpop.eup %278 }
 0x247   :  { %v138_v46 = vmul.f32 %v279_v45, %v136_v44 }
 0x249   :  { %v139_v47 = vsub.f32 2.0, %v138_v46 }
 0x24b   :  { %v140_v48 = vmul.f32 %v279_v45, %v139_v47 }
 0x24d   :  { %v141_v49 = vmul.f32 %v277_v34, %v140_v48 }
 0x24f   :  { %142 = vst.msk [vmem:[#allocation7] sm:$0x3] %vm127_vm6, %v141_v49 }
 0x280   :  { %v156_v50 = vpop.xlane.xlu0 %155 }
 0x281   :  { %280 = vrcp.f32 %v156_v50 }
 0x284   :  { %v176_v51 = vpop.xlane.xlu0 %175 }
 0x285   :  { %282 = vrcp.f32 %v176_v51 }
 0x288   :  { %v216_v52 = vpop.xlane.xlu1 %215  ;;  %v196_v53 = vpop.xlane.xlu0 %195 }
 0x289   :  { %284 = vrcp.f32 %v216_v52 }
 0x28a   :  { %286 = vrcp.f32 %v196_v53 }
 0x28e   :  { %v281_v54 = vpop.eup %280 }
 0x28f   :  { %v158_v55 = vmul.f32 %v281_v54, %v156_v50 }
 0x291   :  { %v159_v56 = vsub.f32 2.0, %v158_v55 }
 0x292   :  { %v283_v57 = vpop.eup %282 }
 0x293   :  { %v160_v58 = vmul.f32 %v281_v54, %v159_v56  ;;  %v178_v59 = vmul.f32 %v283_v57, %v176_v51 }
 0x295   :  { %v161_v60 = vmul.f32 %v269_v27, %v160_v58  ;;  %v179_v61 = vsub.f32 2.0, %v178_v59 }
 0x296   :  { %v285_v62 = vpop.eup %284 }
 0x297   :  { %v287_v63 = vpop.eup %286  ;;  %162 = vst.msk [vmem:[#allocation7] sm:$0x3] %vm143_vm3, %v161_v60  ;;  %v180_v0 = vmul.f32 %v283_v57, %v179_v61  ;;  %v218_v1 = vmul.f32 %v285_v62, %v216_v52 }
 0x298   :  { %v198_v2 = vmul.f32 %v287_v63, %v196_v53 }
 0x299   :  { %v181_v3 = vmul.f32 %v273_v29, %v180_v0  ;;  %v219_v4 = vsub.f32 2.0, %v218_v1 }
 0x29a   :  { %v199_v5 = vsub.f32 2.0, %v198_v2 }
 0x29b   :  { %182 = vst.msk [vmem:[#allocation7] sm:$0x3] %vm163_vm5, %v181_v3  ;;  %v220_v6 = vmul.f32 %v285_v62, %v219_v4 }
 0x29c   :  { %v200_v7 = vmul.f32 %v287_v63, %v199_v5 }
 0x29d   :  { %v221_v8 = vmul.f32 %v275_v30, %v220_v6 }
 0x29e   :  { %v201_v9 = vmul.f32 %v399_v28, %v200_v7 }
 0x2a0   :  { %202 = vst.msk [vmem:[#allocation7] sm:$0x3] %vm183_vm2, %v201_v9 }
 0x2a1   :  { %222 = vst.msk [vmem:[#allocation7] sm:$0x3] %vm203_vm4, %v221_v8 }
 0x2a2   :  { %339 = shalt.err (!%p336_p0)
}
 0x2a3   :  { %232 = dma.vmem_to_hbm [thread:$0]  %s230_s28, 32, %s419_s3, [#allocation4]  }
 0x2a4   :  { %352 = dma.done.wait [#allocation4], 32  }
 0x2a5   :  { %353 = vsyncadd [#allocation4], 4294967264 }
 0x2a6   :  { %236 = vsyncpa [#allocation3], 1 }
 0x2a7   :  { %237 = vsyncpa [#allocation6], 1 }
 0x2a8   :  { %238 = vsyncpa [#allocation4], 1 }

</bundles_post_ra>
